<compile_context>
chip_gen: v7x
topology: tpu7x:2x2x1
jax: 0.10.0
libtpu: 0.0.40
codegen_flags: <defaults>
</compile_context>

<pallas_src>
import jax
import jax.numpy as jnp
from jax import lax
from jax.experimental import pallas as pl
from jax.experimental.pallas import tpu as pltpu

OUT_PAD = 128  # lane-dense padded output width (true output width is 3)


def nlp_rnn_kernel(tokens_ref, table_ref, w_hh_ref, w_out_ref, b_out_ref, o_ref):
    """Fused embedding lookup + RNN recurrence + linear + sigmoid.

    tokens_ref : (S*B, 1)  int32  seq-major flattened token ids (row t*B + b)
    table_ref  : (V, D)    f32    embedding table already projected through
                                  W_ih^T and biased with (b_ih + b_hh)
    w_hh_ref   : (D, D)    bf16   hidden->hidden weight, pre-transposed (h @ W)
    w_out_ref  : (D, 128)  f32    linear weight, pre-transposed + zero-padded
    b_out_ref  : (1, 128)  f32    linear bias, zero-padded
    o_ref      : (B, 128)  f32    sigmoid(logits), columns >= 3 are garbage (0.5)
    """
    B = o_ref.shape[0]
    SB = tokens_ref.shape[0]
    S = SB // B
    V = table_ref.shape[0]

    # --- In-kernel embedding gather (all timesteps at once) via one-hot matmul.
    # Single upfront MXU pass; avoids a separate XLA gather op + HBM round trip.
    # NOTE: out-of-range token ids produce an all-zero row (PyTorch Embedding
    # would raise); only matters for invalid inputs.
    toks = tokens_ref[...]                                             # (S*B, 1)
    onehot = (toks == lax.broadcasted_iota(jnp.int32, (SB, V), 1))
    xproj = jnp.dot(onehot.astype(jnp.float32), table_ref[...],
                    preferred_element_type=jnp.float32)                # (S*B, D)

    # Loop-invariant recurrent weight, already bf16 for the MXU.
    w_hh = w_hh_ref[...]                                               # (D, D)

    # --- Peeled first step: h_0 = 0, so the recurrent term vanishes exactly.
    h = jnp.tanh(xproj[0:B, :])                                        # (B, D) f32

    # --- Remaining steps, fully unrolled (S small & static) so the scheduler
    # can overlap loads with the tanh/MXU latency of the dependent chain.
    # Only the matmul operands are bf16; add + tanh stay f32.
    # TODO(synk): micro-opt — pltpu.matmul_push_rhs to keep W_hh resident in
    # the MXU across the 7 steps; verify with a bundle dump that Mosaic isn't
    # already hoisting the weight push before adopting.
    for t in range(1, S):
        rec = jnp.dot(h.astype(jnp.bfloat16), w_hh,
                      preferred_element_type=jnp.float32)              # (B, D) f32
        h = jnp.tanh(xproj[t * B:(t + 1) * B, :] + rec)

    # --- Final linear + sigmoid into a lane-dense (B, 128) block.
    logits = jnp.dot(h, w_out_ref[...],
                     preferred_element_type=jnp.float32) + b_out_ref[...]
    o_ref[...] = jax.nn.sigmoid(logits)


def init_params(key, vocab_size, vector_dim):
    """Parameters in the original PyTorch layout."""
    k1, k2, k3, k4, k5, k6, k7 = jax.random.split(key, 7)
    scale = 0.1
    return {
        "emb_table": jax.random.normal(k1, (vocab_size, vector_dim), jnp.float32) * scale,
        "w_ih": jax.random.normal(k2, (vector_dim, vector_dim), jnp.float32) * scale,  # torch (H, D)
        "w_hh": jax.random.normal(k3, (vector_dim, vector_dim), jnp.float32) * scale,  # torch (H, H)
        "b_ih": jax.random.normal(k4, (vector_dim,), jnp.float32) * scale,
        "b_hh": jax.random.normal(k5, (vector_dim,), jnp.float32) * scale,
        "w_lin": jax.random.normal(k6, (3, vector_dim), jnp.float32) * scale,           # torch (3, H)
        "b_lin": jax.random.normal(k7, (3,), jnp.float32) * scale,
    }


def prepare_params(params):
    """One-time folding / transposition / padding of parameters.

    * table_proj = emb @ W_ih^T + (b_ih + b_hh): the per-step work in the
      kernel is then only the recurrent matmul + tanh (exact in f32).
    * W_hh is pre-transposed and pre-cast to bf16 (MXU operand).
    * W_lin / b_lin are pre-transposed and zero-padded to 128 output lanes so
      the kernel's store is lane-dense (unmasked vst).
    """
    D = params["w_hh"].shape[0]
    table_proj = (params["emb_table"] @ params["w_ih"].T
                  + (params["b_ih"] + params["b_hh"]))                 # (V, D)
    w_out_pad = jnp.zeros((D, OUT_PAD), jnp.float32).at[:, :3].set(
        params["w_lin"].T.astype(jnp.float32))
    b_out_pad = jnp.zeros((1, OUT_PAD), jnp.float32).at[:, :3].set(
        params["b_lin"].astype(jnp.float32))
    return {
        "table_proj": table_proj.astype(jnp.float32),                  # (V, D)
        "w_hh_bf16": params["w_hh"].T.astype(jnp.bfloat16),            # (D, D)
        "w_out_pad": w_out_pad,                                        # (D, 128)
        "b_out_pad": b_out_pad,                                        # (1, 128)
    }


def nlp_forward(prepared, tokens):
    """tokens: (B, S) int32.  Returns (B, 3) f32."""
    B, S = tokens.shape
    # Seq-major flattened token ids: row t*B + b holds tokens[b, t].
    toks_flat = tokens.T.reshape(S * B, 1).astype(jnp.int32)

    # Grid-less single invocation: everything (few KB) lives in VMEM.  If this
    # ever serves many independent requests, batch them into this one call
    # (h is only (B, D) of an (8, 128) vreg) instead of issuing more tiny
    # kernels; add a batch grid axis + dimension_semantics=("parallel",) only
    # when B grows enough to feed both v7x TensorCores.
    vmem = pl.BlockSpec(memory_space=pltpu.MemorySpace.VMEM)
    out_pad = pl.pallas_call(
        nlp_rnn_kernel,
        out_shape=jax.ShapeDtypeStruct((B, OUT_PAD), jnp.float32),
        in_specs=[vmem] * 5,
        out_specs=vmem,
    )(toks_flat, prepared["table_proj"], prepared["w_hh_bf16"],
      prepared["w_out_pad"], prepared["b_out_pad"])
    return out_pad[:, :3]


def nlp_forward_ref(params, tokens):
    """Pure-JAX (f32) reference of the PyTorch forward for validation."""
    emb = jnp.take(params["emb_table"], tokens, axis=0)                # (B, S, D)
    B, S, D = emb.shape
    h = jnp.zeros((B, D), jnp.float32)
    for t in range(S):
        h = jnp.tanh(emb[:, t, :] @ params["w_ih"].T + params["b_ih"]
                     + h @ params["w_hh"].T + params["b_hh"])
    logits = h @ params["w_lin"].T + params["b_lin"]
    return jax.nn.sigmoid(logits)


if __name__ == "__main__":
    # Small, module-consistent shapes: vector_dim=32, sentence_length=8, vocab=30, batch=2.
    vector_dim = 32
    sentence_length = 8
    vocab_size = 30
    batch = 2

    key = jax.random.PRNGKey(0)
    pkey, tkey = jax.random.split(key)
    params = init_params(pkey, vocab_size, vector_dim)
    prepared = prepare_params(params)
    tokens = jax.random.randint(tkey, (batch, sentence_length), 0, vocab_size,
                                dtype=jnp.int32)

    y = nlp_forward(prepared, tokens)
    y = jax.block_until_ready(y)

    y_ref = nlp_forward_ref(params, tokens)
    assert y.shape == (batch, 3)
    # bf16 MXU operands in the recurrence -> slightly looser tolerance vs. the
    # pure-f32 reference (error is a few e-4 at these magnitudes).
    assert jnp.allclose(y, y_ref, atol=1e-2, rtol=1e-2), "mismatch vs reference"

    print("KERNEL_OK")
</pallas_src>

<mosaic_0001>
module attributes {stable_mosaic.version = 11 : i64} {
  func.func @nlp_rnn_kernel(%arg0: memref<16x1xi32, #tpu.memory_space<vmem>>, %arg1: memref<30x32xf32, #tpu.memory_space<vmem>>, %arg2: memref<32x32xbf16, #tpu.memory_space<vmem>>, %arg3: memref<32x128xf32, #tpu.memory_space<vmem>>, %arg4: memref<1x128xf32, #tpu.memory_space<vmem>>, %arg5: memref<2x128xf32, #tpu.memory_space<vmem>>) attributes {dimension_semantics = [], scalar_prefetch = 0 : i64, scratch_operands = 0 : i64, tpu.core_type = #tpu.core_type<tc>} {
    %c0 = arith.constant 0 : index
    %c0_0 = arith.constant 0 : index
    %0 = vector.load %arg0[%c0, %c0_0] : memref<16x1xi32, #tpu.memory_space<vmem>>, vector<16x1xi32>
    %1 = tpu.iota {dimensions = array<i32: 1>} : vector<16x30xi32>
    %2 = vector.broadcast %0 : vector<16x1xi32> to vector<16x30xi32>
    %3 = arith.cmpi eq, %2, %1 : vector<16x30xi32>
    %4 = arith.extui %3 : vector<16x30xi1> to vector<16x30xi32>
    %5 = arith.sitofp %4 : vector<16x30xi32> to vector<16x30xf32>
    %c0_1 = arith.constant 0 : index
    %c0_2 = arith.constant 0 : index
    %6 = vector.load %arg1[%c0_1, %c0_2] : memref<30x32xf32, #tpu.memory_space<vmem>>, vector<30x32xf32>
    %cst = arith.constant dense<0.000000e+00> : vector<16x32xf32>
    %7 = tpu.matmul %5, %6, %cst {dimension_numbers = #tpu.dot_dimension_numbers<[1], [0], [0], [1], [0, 0, 1, 1], [], []>} : vector<16x30xf32>, vector<30x32xf32>, vector<16x32xf32> -> vector<16x32xf32>
    %c0_3 = arith.constant 0 : index
    %c0_4 = arith.constant 0 : index
    %8 = vector.load %arg2[%c0_3, %c0_4] : memref<32x32xbf16, #tpu.memory_space<vmem>>, vector<32x32xbf16>
    %9 = vector.extract_strided_slice %7 {offsets = [0, 0], sizes = [2, 32], strides = [1, 1]} : vector<16x32xf32> to vector<2x32xf32>
    %10 = math.tanh %9 : vector<2x32xf32>
    %11 = arith.truncf %10 : vector<2x32xf32> to vector<2x32xbf16>
    %cst_5 = arith.constant dense<0.000000e+00> : vector<2x32xf32>
    %12 = tpu.matmul %11, %8, %cst_5 {dimension_numbers = #tpu.dot_dimension_numbers<[1], [0], [0], [1], [0, 0, 1, 1], [], []>} : vector<2x32xbf16>, vector<32x32xbf16>, vector<2x32xf32> -> vector<2x32xf32>
    %13 = vector.extract_strided_slice %7 {offsets = [2, 0], sizes = [2, 32], strides = [1, 1]} : vector<16x32xf32> to vector<2x32xf32>
    %14 = arith.addf %13, %12 : vector<2x32xf32>
    %15 = math.tanh %14 : vector<2x32xf32>
    %16 = arith.truncf %15 : vector<2x32xf32> to vector<2x32xbf16>
    %cst_6 = arith.constant dense<0.000000e+00> : vector<2x32xf32>
    %17 = tpu.matmul %16, %8, %cst_6 {dimension_numbers = #tpu.dot_dimension_numbers<[1], [0], [0], [1], [0, 0, 1, 1], [], []>} : vector<2x32xbf16>, vector<32x32xbf16>, vector<2x32xf32> -> vector<2x32xf32>
    %18 = vector.extract_strided_slice %7 {offsets = [4, 0], sizes = [2, 32], strides = [1, 1]} : vector<16x32xf32> to vector<2x32xf32>
    %19 = arith.addf %18, %17 : vector<2x32xf32>
    %20 = math.tanh %19 : vector<2x32xf32>
    %21 = arith.truncf %20 : vector<2x32xf32> to vector<2x32xbf16>
    %cst_7 = arith.constant dense<0.000000e+00> : vector<2x32xf32>
    %22 = tpu.matmul %21, %8, %cst_7 {dimension_numbers = #tpu.dot_dimension_numbers<[1], [0], [0], [1], [0, 0, 1, 1], [], []>} : vector<2x32xbf16>, vector<32x32xbf16>, vector<2x32xf32> -> vector<2x32xf32>
    %23 = vector.extract_strided_slice %7 {offsets = [6, 0], sizes = [2, 32], strides = [1, 1]} : vector<16x32xf32> to vector<2x32xf32>
    %24 = arith.addf %23, %22 : vector<2x32xf32>
    %25 = math.tanh %24 : vector<2x32xf32>
    %26 = arith.truncf %25 : vector<2x32xf32> to vector<2x32xbf16>
    %cst_8 = arith.constant dense<0.000000e+00> : vector<2x32xf32>
    %27 = tpu.matmul %26, %8, %cst_8 {dimension_numbers = #tpu.dot_dimension_numbers<[1], [0], [0], [1], [0, 0, 1, 1], [], []>} : vector<2x32xbf16>, vector<32x32xbf16>, vector<2x32xf32> -> vector<2x32xf32>
    %28 = vector.extract_strided_slice %7 {offsets = [8, 0], sizes = [2, 32], strides = [1, 1]} : vector<16x32xf32> to vector<2x32xf32>
    %29 = arith.addf %28, %27 : vector<2x32xf32>
    %30 = math.tanh %29 : vector<2x32xf32>
    %31 = arith.truncf %30 : vector<2x32xf32> to vector<2x32xbf16>
    %cst_9 = arith.constant dense<0.000000e+00> : vector<2x32xf32>
    %32 = tpu.matmul %31, %8, %cst_9 {dimension_numbers = #tpu.dot_dimension_numbers<[1], [0], [0], [1], [0, 0, 1, 1], [], []>} : vector<2x32xbf16>, vector<32x32xbf16>, vector<2x32xf32> -> vector<2x32xf32>
    %33 = vector.extract_strided_slice %7 {offsets = [10, 0], sizes = [2, 32], strides = [1, 1]} : vector<16x32xf32> to vector<2x32xf32>
    %34 = arith.addf %33, %32 : vector<2x32xf32>
    %35 = math.tanh %34 : vector<2x32xf32>
    %36 = arith.truncf %35 : vector<2x32xf32> to vector<2x32xbf16>
    %cst_10 = arith.constant dense<0.000000e+00> : vector<2x32xf32>
    %37 = tpu.matmul %36, %8, %cst_10 {dimension_numbers = #tpu.dot_dimension_numbers<[1], [0], [0], [1], [0, 0, 1, 1], [], []>} : vector<2x32xbf16>, vector<32x32xbf16>, vector<2x32xf32> -> vector<2x32xf32>
    %38 = vector.extract_strided_slice %7 {offsets = [12, 0], sizes = [2, 32], strides = [1, 1]} : vector<16x32xf32> to vector<2x32xf32>
    %39 = arith.addf %38, %37 : vector<2x32xf32>
    %40 = math.tanh %39 : vector<2x32xf32>
    %41 = arith.truncf %40 : vector<2x32xf32> to vector<2x32xbf16>
    %cst_11 = arith.constant dense<0.000000e+00> : vector<2x32xf32>
    %42 = tpu.matmul %41, %8, %cst_11 {dimension_numbers = #tpu.dot_dimension_numbers<[1], [0], [0], [1], [0, 0, 1, 1], [], []>} : vector<2x32xbf16>, vector<32x32xbf16>, vector<2x32xf32> -> vector<2x32xf32>
    %43 = vector.extract_strided_slice %7 {offsets = [14, 0], sizes = [2, 32], strides = [1, 1]} : vector<16x32xf32> to vector<2x32xf32>
    %44 = arith.addf %43, %42 : vector<2x32xf32>
    %45 = math.tanh %44 : vector<2x32xf32>
    %c0_12 = arith.constant 0 : index
    %c0_13 = arith.constant 0 : index
    %46 = vector.load %arg3[%c0_12, %c0_13] : memref<32x128xf32, #tpu.memory_space<vmem>>, vector<32x128xf32>
    %cst_14 = arith.constant dense<0.000000e+00> : vector<2x128xf32>
    %47 = tpu.matmul %45, %46, %cst_14 {dimension_numbers = #tpu.dot_dimension_numbers<[1], [0], [0], [1], [0, 0, 1, 1], [], []>} : vector<2x32xf32>, vector<32x128xf32>, vector<2x128xf32> -> vector<2x128xf32>
    %c0_15 = arith.constant 0 : index
    %c0_16 = arith.constant 0 : index
    %48 = vector.load %arg4[%c0_15, %c0_16] : memref<1x128xf32, #tpu.memory_space<vmem>>, vector<1x128xf32>
    %49 = vector.broadcast %48 : vector<1x128xf32> to vector<2x128xf32>
    %50 = arith.addf %47, %49 : vector<2x128xf32>
    %51 = arith.negf %50 : vector<2x128xf32>
    %52 = math.exp %51 : vector<2x128xf32>
    %cst_17 = arith.constant 1.000000e+00 : f32
    %53 = vector.broadcast %cst_17 : f32 to vector<2x128xf32>
    %54 = arith.addf %53, %52 : vector<2x128xf32>
    %55 = arith.divf %53, %54 : vector<2x128xf32>
    %c0_18 = arith.constant 0 : index
    %c0_19 = arith.constant 0 : index
    %56 = vector.load %arg5[%c0_18, %c0_19] : memref<2x128xf32, #tpu.memory_space<vmem>>, vector<2x128xf32>
    tpu.vector_store %arg5[%c0_18, %c0_19], %55 {strides = array<i32>} : memref<2x128xf32, #tpu.memory_space<vmem>>, vector<2x128xf32>,
    return
  }
}

</mosaic_0001>

<bundles_post_ra>
// kernel: tpu_custom_call.1
= control target key start
LH: loop header
LB: loop body
LE: loop exit
PB: predicated region body
PF: predicated region fallthrough
CT: control target
= control target key end

     0   :  { %10 = vsyncpa [#allocation3], 0  ;;  %s1035_s0 = inlined_call_operand.vmem [shape: s32[16,1], index: 0, kind: input, shape index: {}]   ;;  %s1036_s1 = inlined_call_operand.hbm [shape: f32[30,32], index: 1, kind: input, shape index: {}]   ;;  %s1037_s2 = inlined_call_operand.vmem [shape: bf16[32,32], index: 2, kind: input, shape index: {}]   ;;  %s1038_s3 = inlined_call_operand.hbm [shape: f32[32,128], index: 3, kind: input, shape index: {}]   ;;  %s1039_s4 = inlined_call_operand.vmem [shape: f32[1,128], index: 4, kind: input, shape index: {}]   ;;  %s1040_s5 = inlined_call_operand.hbm [shape: f32[2,128], index: 5, kind: output, shape index: {}]  }
   0x1   :  { %11 = vsyncpa [#allocation6], 0 }
   0x2   :  { %12 = vsyncpa [#allocation4], 0  ;;  %s880_s18 = smov [#allocation2]   ;;  %s808_s22 = scalar_lea.hbm %s1036_s1, 512 }
   0x3   :  { %s20_s19 = sshll.u32 %s880_s18, 4  ;;  %p809_p0 = scmp.ne.s32.totalorder %s1036_s1, %s808_s22  ;;  %s21_s19 = int_to_ptr.vmem [resolvable:$true] %s20_s19 }
   0x4   :  { %p812_p1 = scmp.lt.u32.totalorder %s808_s22, %s1036_s1 }
   0x6   :  { %p814_p2 = pnand %p812_p1, %p809_p0 }
   0x8   :  { %817 = shalt.err (!%p814_p2)
}
   0x9   :  { %s818_s27 = scalar_lea.vmem %s21_s19, 512  ;;  %p823_p4 = scmp.lt.s32.totalorder %s21_s19, %s21_s19 }
   0xa   :  { %p819_p3 = scmp.ne.s32.totalorder %s21_s19, %s818_s27  ;;  %p824_p5 = scmp.lt.s32.totalorder %s818_s27, %s818_s27 }
   0xc   :  { %p825_p6 = por %p824_p5, %p823_p4 }
   0xe   :  { %p826_p7 = pnand %p825_p6, %p819_p3 }
  0x10   :  { %829 = shalt.err (!%p826_p7)
}
  0x11   :  { %s881_s28 = smov 128   ;;  %s882_s29 = smov 8  }
  0x12   :  { %26 = dma.hbm_to_vmem [thread:$0]  %s1036_s1, 512, %s21_s19, [#allocation3], %s881_s28, %s881_s28, %s882_s29  }
  0x13   :  { %s883_s7 = smov [#allocation5]   ;;  %s830_s11 = scalar_lea.hbm %s1038_s3, 512 }
  0x14   :  { %s34_s8 = sshll.u32 %s883_s7, 4  ;;  %p831_p8 = scmp.ne.s32.totalorder %s1038_s3, %s830_s11  ;;  %s35_s8 = int_to_ptr.vmem [resolvable:$true] %s34_s8 }
  0x15   :  { %p834_p9 = scmp.lt.u32.totalorder %s830_s11, %s1038_s3 }
  0x17   :  { %p836_p10 = pnand %p834_p9, %p831_p8 }
  0x19   :  { %839 = shalt.err (!%p836_p10)
}
  0x1a   :  { %s840_s16 = scalar_lea.vmem %s35_s8, 512  ;;  %p845_p12 = scmp.lt.s32.totalorder %s35_s8, %s35_s8 }
  0x1b   :  { %p841_p11 = scmp.ne.s32.totalorder %s35_s8, %s840_s16  ;;  %p846_p13 = scmp.lt.s32.totalorder %s840_s16, %s840_s16 }
  0x1d   :  { %p847_p0 = por %p846_p13, %p845_p12 }
  0x1f   :  { %p848_p1 = pnand %p847_p0, %p841_p11 }
  0x21   :  { %851 = shalt.err (!%p848_p1)
}
  0x22   :  { %40 = dma.hbm_to_vmem [thread:$0]  %s1038_s3, 512, %s35_s8, [#allocation6], %s881_s28, %s881_s28, %s882_s29  }
  0x23   :  { %874 = dma.done.wait [#allocation3], 512  }
  0x24   :  { %875 = vsyncadd [#allocation3], 4294966784 }
  0x25   :  { %876 = dma.done.wait [#allocation6], 512  }
  0x26   :  { %877 = vsyncadd [#allocation6], 4294966784  ;;  %v884_v0 = vmov 0   ;;  %v50_v1 = vld [vmem:[%s1035_s0] sm:$0xff]  ;;  %v66_v2 = vld [vmem:[#allocation2] sm:$0xff]  ;;  %vm77_vm0 = vcmask 1045504   ;;  %v52_v10 = vlaneseq }
  0x27   :  { %785 = vset.pattern.permute.xlu0 %v884_v0  ;;  %v67_v3 = vld [vmem:[#allocation2 + $0x8] sm:$0xff]  ;;  %v68_v4 = vld [vmem:[#allocation2 + $0x10] sm:$0xff]  ;;  %v69_v5 = vld [vmem:[#allocation2 + $0x18] sm:$0x3f]  ;;  %vm885_vm1 = vmmov 1   ;;  %v886_v9 = vmov 0.0  }
  0x28   :  { %55 = vperm.xlu0 %785, %v50_v1   ;;  %v51_v6 = vld [vmem:[%s1035_s0 + $0x8] sm:$0xff]  ;;  %v759_v7 = vpack.c.bf16 %v67_v3, %v66_v2  ;;  %v763_v8 = vpack.c.bf16 %v69_v5, %v68_v4  ;;  %vm764_vm2 = vmpackc.low %vm77_vm0, %vm885_vm1  ;;  %692 = vmatprep.subr.bf16.mxu1 %v886_v9  ;;  %v53_v11 = vand.u32 127, %v52_v10  ;;  %vm70_vm3 = vcmask 244736   ;;  %v957_v16 = vld [vmem:[%s1037_s2] sm:$0xff]   ;;  %s889_s25 = smov [#allocation7]  }
  0x29   :  { %vm887_vm6 = vmmov 0   ;;  %693 = vmatpush3.bf16.msra.mxu1 %v957_v16  ;;  %v967_v17 = vld [vmem:[%s1037_s2 + $0x8] sm:$0xff]   ;;  %vm174_vm7 = vcmask 261120   ;;  %s622_s26 = sshll.u32 %s889_s25, 4  ;;  %s623_s26 = int_to_ptr.vmem [resolvable:$true] %s622_s26 }
  0x2a   :  { %760 = vmatprep.subr.bf16.mxu0 %v759_v7  ;;  %696 = vmatprep.mubr.msk.bf16.mxu1 %vm887_vm6, %v886_v9  ;;  %s852_s27 = scalar_lea.vmem %s623_s26, 32  ;;  %p857_p3 = scmp.lt.s32.totalorder %s623_s26, %s623_s26 }
  0x2b   :  { %762 = vmatpush3.bf16.msra.mxu0 %v759_v7  ;;  %694 = vmatprep.subr.bf16.mxu1 %v886_v9  ;;  %p853_p2 = scmp.ne.s32.totalorder %s623_s26, %s852_s27  ;;  %p858_p4 = scmp.lt.s32.totalorder %s852_s27, %s852_s27 }
  0x2c   :  { %58 = vperm.xlu0 %785, %v51_v6   ;;  %765 = vmatprep.subr.msk.bf16.mxu0 %vm764_vm2, %v763_v8 }
  0x2d   :  { %695 = vmatpush3.bf16.msra.mxu1 %v967_v17  ;;  %p859_p5 = por %p858_p4, %p857_p3 }
  0x2e   :  { %708 = vmatprep.subr.bf16.mxu1 %v886_v9 }
  0x2f   :  { %768 = vmatpush3.bf16.msk.msra.mxu0 %vm764_vm2, %v763_v8  ;;  %p860_p6 = pnand %p859_p5, %p853_p2 }
  0x30   :  { %700 = vmatprep.subr.bf16.mxu0 %v886_v9 }
  0xa7   :  { %v56_v12 = vpop.permute.xlu0 %55 }
  0xa8   :  { %vm60_vm4 = vcmp.eq.s32.totalorder %v56_v12, %v53_v11  ;;  %v525_v12 = vld [vmem:[#allocation5 + $0x8] sm:$0xff] }
  0xa9   :  { %v632_v13 = vsel %vm60_vm4, 1.0, %v886_v9 }
  0xaa   :  { %689 = vmatprep.mubr.msk.f32.mxu0 %vm70_vm3, %v632_v13 }
  0xab   :  { %v59_v14 = vpop.permute.xlu0 %58 }
  0xac   :  { %vm61_vm5 = vcmp.eq.s32.totalorder %v59_v14, %v53_v11  ;;  %v524_v11 = vld [vmem:[#allocation5] sm:$0xff]  ;;  %v888_v14 = vmov 0.0|0.0  }
  0xad   :  { %v633_v15 = vsel %vm61_vm5, 1.0, %v886_v9  ;;  %v770_v13 = vpack.c.bf16 %v525_v12, %v524_v11 }
  0xae   :  { %690 = vmatmul.mubr.msk.f32.vlgmr.msra.gmra.mrb[0].mxu0 %vm70_vm3, %v633_v15  ;;  %v527_v15 = vld [vmem:[#allocation5 + $0x18] sm:$0xff] }
  0xaf   :  { %704 = vmatprep.mubr.msk.bf16.mxu0 %vm887_vm6, %v886_v9  ;;  %701 = vmatpush3.bf16.msra.mxu0 %v957_v16 }
  0xb0   :  { %702 = vmatprep.subr.bf16.mxu0 %v886_v9 }
  0xb3   :  { %703 = vmatpush3.bf16.msra.mxu0 %v967_v17 }
  0xb4   :  { %716 = vmatprep.subr.bf16.mxu0 %v886_v9 }
 0x181   :  { %v976_v18 = vpop.f32.mrb[0].mxu0 }
 0x182   :  { %v147_v19 = vpop.f32.mrb[1].mxu0 }
 0x183   :  { %788 = vtanh.f32 %v147_v19 }
 0x18d   :  { %v789_v20 = vpop.eup %788 }
 0x18e   :  { %v161_v21 = vpack.c.bf16 %v789_v20, %v789_v20 }
 0x190   :  { %697 = vmatmul.mubr.msk.bf16.vlgmr.msra.gmra.mrb[0].mxu1 %vm174_vm7, %v161_v21 }
 0x191   :  { %709 = vmatpush3.bf16.msra.mxu1 %v957_v16  ;;  %712 = vmatprep.mubr.msk.bf16.mxu1 %vm887_vm6, %v886_v9 }
 0x192   :  { %710 = vmatprep.subr.bf16.mxu1 %v886_v9 }
 0x195   :  { %711 = vmatpush3.bf16.msra.mxu1 %v967_v17 }
 0x196   :  { %724 = vmatprep.subr.bf16.mxu1 %v886_v9 }
 0x263   :  { %v212_v22 = vpop.f32.mrb[0].mxu1 }
 0x264   :  { %v219_v23 = vrot.slane %v212_v22, 6  ;;  %v698_v24 = vpop.f32.mrb[1].mxu1 }
 0x265   :  { %v215_v25 = vpop.f32.mrb[2].mxu1 }
 0x266   :  { %v221_v26 = vadd.f32 %v219_v23, %v147_v19  ;;  %v699_v27 = vpop.f32.mrb[3].mxu1 }
 0x268   :  { %790 = vtanh.f32 %v221_v26  ;;  %v646_v26 = vld [vmem:[%s1039_s4] ss:$0 sm:$0xff] }
 0x272   :  { %v791_v28 = vpop.eup %790 }
 0x273   :  { %v223_v29 = vpack.c.bf16 %v791_v28, %v791_v28 }
 0x275   :  { %v225_v30 = vrot.slane %v223_v29, 1 }
 0x277   :  { %705 = vmatmul.mubr.msk.bf16.vlgmr.msra.gmra.mrb[4].mxu0 %vm174_vm7, %v225_v30 }
 0x278   :  { %717 = vmatpush3.bf16.msra.mxu0 %v957_v16  ;;  %720 = vmatprep.mubr.msk.bf16.mxu0 %vm887_vm6, %v886_v9 }
 0x279   :  { %718 = vmatprep.subr.bf16.mxu0 %v886_v9 }
 0x27c   :  { %719 = vmatpush3.bf16.msra.mxu0 %v967_v17 }
 0x27d   :  { %732 = vmatprep.subr.bf16.mxu0 %v886_v9 }
 0x34a   :  { %v263_v31 = vpop.f32.mrb[4].mxu0 }
 0x34b   :  { %v270_v32 = vrot.slane %v263_v31, 4  ;;  %v706_v33 = vpop.f32.mrb[5].mxu0 }
 0x34c   :  { %v266_v34 = vpop.f32.mrb[6].mxu0 }
 0x34d   :  { %v272_v35 = vadd.f32 %v270_v32, %v147_v19  ;;  %v707_v36 = vpop.f32.mrb[7].mxu0 }
 0x34f   :  { %792 = vtanh.f32 %v272_v35 }
 0x359   :  { %v793_v37 = vpop.eup %792 }
 0x35a   :  { %v274_v38 = vpack.c.bf16 %v793_v37, %v793_v37 }
 0x35c   :  { %v276_v39 = vrot.slane %v274_v38, 2 }
 0x35e   :  { %713 = vmatmul.mubr.msk.bf16.vlgmr.msra.gmra.mrb[4].mxu1 %vm174_vm7, %v276_v39 }
 0x35f   :  { %725 = vmatpush3.bf16.msra.mxu1 %v957_v16  ;;  %728 = vmatprep.mubr.msk.bf16.mxu1 %vm887_vm6, %v886_v9 }
 0x360   :  { %726 = vmatprep.subr.bf16.mxu1 %v886_v9 }
 0x363   :  { %727 = vmatpush3.bf16.msra.mxu1 %v967_v17 }
 0x364   :  { %740 = vmatprep.subr.bf16.mxu1 %v886_v9 }
 0x431   :  { %v314_v40 = vpop.f32.mrb[4].mxu1 }
 0x432   :  { %v321_v41 = vrot.slane %v314_v40, 2  ;;  %v714_v42 = vpop.f32.mrb[5].mxu1 }
 0x433   :  { %v317_v43 = vpop.f32.mrb[6].mxu1 }
 0x434   :  { %v323_v44 = vadd.f32 %v321_v41, %v147_v19  ;;  %v715_v45 = vpop.f32.mrb[7].mxu1 }
 0x436   :  { %794 = vtanh.f32 %v323_v44 }
 0x440   :  { %v795_v46 = vpop.eup %794 }
 0x441   :  { %v325_v47 = vpack.c.bf16 %v795_v46, %v795_v46 }
 0x443   :  { %v327_v48 = vrot.slane %v325_v47, 3 }
 0x445   :  { %721 = vmatmul.mubr.msk.bf16.vlgmr.msra.gmra.mrb[8].mxu0 %vm174_vm7, %v327_v48 }
 0x446   :  { %733 = vmatpush3.bf16.msra.mxu0 %v957_v16  ;;  %736 = vmatprep.mubr.msk.bf16.mxu0 %vm887_vm6, %v886_v9 }
 0x447   :  { %734 = vmatprep.subr.bf16.mxu0 %v886_v9 }
 0x44a   :  { %735 = vmatpush3.bf16.msra.mxu0 %v967_v17 }
 0x44b   :  { %769 = vmatprep.subr.bf16.mxu0 %v888_v14 }
 0x518   :  { %v365_v49 = vpop.f32.mrb[8].mxu0 }
 0x519   :  { %v371_v50 = vadd.f32 %v976_v18, %v365_v49  ;;  %v722_v51 = vpop.f32.mrb[9].mxu0 }
 0x51a   :  { %v368_v52 = vpop.f32.mrb[10].mxu0 }
 0x51b   :  { %796 = vtanh.f32 %v371_v50  ;;  %v723_v53 = vpop.f32.mrb[11].mxu0 }
 0x525   :  { %v797_v54 = vpop.eup %796 }
 0x526   :  { %v373_v55 = vpack.c.bf16 %v797_v54, %v797_v54 }
 0x528   :  { %729 = vmatmul.mubr.msk.bf16.vlgmr.msra.gmra.mrb[8].mxu1 %vm174_vm7, %v373_v55 }
 0x529   :  { %741 = vmatpush3.bf16.msra.mxu1 %v957_v16  ;;  %744 = vmatprep.mubr.msk.bf16.mxu1 %vm887_vm6, %v886_v9 }
 0x52a   :  { %742 = vmatprep.subr.bf16.mxu1 %v886_v9 }
 0x52d   :  { %743 = vmatpush3.bf16.msra.mxu1 %v967_v17 }
 0x5fb   :  { %v411_v56 = vpop.f32.mrb[8].mxu1 }
 0x5fc   :  { %v418_v57 = vrot.slane %v411_v56, 6  ;;  %v730_v58 = vpop.f32.mrb[9].mxu1 }
 0x5fd   :  { %v414_v59 = vpop.f32.mrb[10].mxu1 }
 0x5fe   :  { %v420_v60 = vadd.f32 %v976_v18, %v418_v57  ;;  %v731_v61 = vpop.f32.mrb[11].mxu1 }
 0x600   :  { %798 = vtanh.f32 %v420_v60 }
 0x60a   :  { %v799_v62 = vpop.eup %798 }
 0x60b   :  { %v422_v63 = vpack.c.bf16 %v799_v62, %v799_v62 }
 0x60d   :  { %v424_v0 = vrot.slane %v422_v63, 1 }
 0x60f   :  { %737 = vmatmul.mubr.msk.bf16.vlgmr.msra.gmra.mrb[12].mxu0 %vm174_vm7, %v424_v0 }
 0x610   :  { %756 = vmatprep.mubr.msk.f32.mxu0 %vm887_vm6, %v886_v9  ;;  %771 = vmatpush3.bf16.msra.mxu0 %v770_v13  ;;  %v526_v9 = vld [vmem:[#allocation5 + $0x10] sm:$0xff] }
 0x611   :  { %772 = vmatprep.subr.bf16.mxu0 %v888_v14  ;;  %v773_v16 = vpack.c.bf16 %v527_v15, %v526_v9 }
 0x614   :  { %774 = vmatpush3.bf16.msra.mxu0 %v773_v16 }
 0x6e2   :  { %v462_v1 = vpop.f32.mrb[12].mxu0 }
 0x6e3   :  { %v469_v2 = vrot.slane %v462_v1, 4  ;;  %v738_v3 = vpop.f32.mrb[13].mxu0 }
 0x6e4   :  { %v465_v4 = vpop.f32.mrb[14].mxu0 }
 0x6e5   :  { %v471_v5 = vadd.f32 %v976_v18, %v469_v2  ;;  %v739_v6 = vpop.f32.mrb[15].mxu0 }
 0x6e7   :  { %800 = vtanh.f32 %v471_v5 }
 0x6f1   :  { %v801_v7 = vpop.eup %800 }
 0x6f2   :  { %v473_v8 = vpack.c.bf16 %v801_v7, %v801_v7 }
 0x6f4   :  { %v475_v10 = vrot.slane %v473_v8, 2 }
 0x6f6   :  { %745 = vmatmul.mubr.msk.bf16.vlgmr.msra.gmra.mrb[12].mxu1 %vm174_vm7, %v475_v10 }
 0x7c9   :  { %v513_v17 = vpop.f32.mrb[12].mxu1 }
 0x7ca   :  { %v520_v19 = vrot.slane %v513_v17, 2  ;;  %v746_v20 = vpop.f32.mrb[13].mxu1 }
 0x7cb   :  { %v516_v21 = vpop.f32.mrb[14].mxu1 }
 0x7cc   :  { %v522_v22 = vadd.f32 %v976_v18, %v520_v19  ;;  %v747_v23 = vpop.f32.mrb[15].mxu1 }
 0x7ce   :  { %802 = vtanh.f32 %v522_v22 }
 0x7d8   :  { %v803_v24 = vpop.eup %802 }
 0x7d9   :  { %v536_v25 = vrot.slane %v803_v24, 6 }
 0x7db   :  { %757 = vmatmul.mubr.msk.f32.vlgmr.msra.gmra.mrb[2].mxu0 %vm174_vm7, %v536_v25 }
 0x8ae   :  { %v605_v27 = vpop.f32.mrb[2].mxu0 }
 0x8af   :  { %v606_v28 = vadd.f32 %v646_v26, %v605_v27  ;;  %v758_v29 = vpop.f32.mrb[3].mxu0 }
 0x8b1   :  { %v648_v30 = vmul.f32 -1.442695, %v606_v28 }
 0x8b3   :  { %804 = vpow2.f32 %v648_v30 }
 0x8bd   :  { %v805_v31 = vpop.eup %804 }
 0x8be   :  { %v612_v32 = vadd.f32 1.0, %v805_v31 }
 0x8c0   :  { %806 = vrcp.f32 %v612_v32 }
 0x8ca   :  { %v807_v18 = vpop.eup %806 }
 0x8cb   :  { %615 = vst [vmem:[#allocation7] sm:$0x3] %v807_v18 }
 0x8cc   :  { %863 = shalt.err (!%p860_p6)
}
 0x8cd   :  { %s864_s29 = scalar_lea.hbm %s1040_s5, 32 }
 0x8ce   :  { %p865_p7 = scmp.ne.s32.totalorder %s1040_s5, %s864_s29  ;;  %p868_p8 = scmp.lt.u32.totalorder %s864_s29, %s1040_s5 }
 0x8d0   :  { %p870_p9 = pnand %p868_p8, %p865_p7 }
 0x8d2   :  { %873 = shalt.err (!%p870_p9)
}
 0x8d3   :  { %625 = dma.vmem_to_hbm [thread:$0]  %s623_s26, 32, %s1040_s5, [#allocation4]  }
 0x8d4   :  { %878 = dma.done.wait [#allocation4], 32  }
 0x8d5   :  { %879 = vsyncadd [#allocation4], 4294967264 }
 0x8d6   :  { %629 = vsyncpa [#allocation3], 1 }
 0x8d7   :  { %630 = vsyncpa [#allocation6], 1 }
 0x8d8   :  { %631 = vsyncpa [#allocation4], 1 }

</bundles_post_ra>
